<compile_context>
chip_gen: v7x
topology: tpu7x:2x2x1
jax: 0.10.0
libtpu: 0.0.40
codegen_flags: <defaults>
</compile_context>

<pallas_src>
import jax
import jax.numpy as jnp
from jax import lax
from jax.experimental import pallas as pl
from jax.experimental.pallas import tpu as pltpu


# Packed-parameter offsets (row-major): w1(8,6) b1(6) w2(6,4) b2(4) w3(4,1) b3(1)
_W1, _B1 = 0, 48
_W2, _B2 = 54, 78
_W3, _B3 = 82, 86
_N_PARAMS = 87

_CHUNK_ROWS = 8  # 8 sublanes -> one f32 vreg per feature plane per chunk


def _sigmoid(v):
    # Exact sigmoid via a single EUP transcendental (tanh); no approx error and
    # half the EUP pressure of exp + reciprocal.
    return 0.5 + 0.5 * jnp.tanh(0.5 * v)


def mlp_kernel(p_ref, x_ref, o_ref):
    # p_ref: (87,) f32 in SMEM (scalar reads -> sregs -> VPU broadcast)
    # x_ref: (8, TR, 128) f32 in VMEM -- feature planes, batch dense on (sublane, lane)
    # o_ref: (1, TR, 128) f32 in VMEM

    # Hoist every weight/bias scalar read out of the compute loops (once / step).
    w1 = [[p_ref[_W1 + k * 6 + j] for j in range(6)] for k in range(8)]
    b1 = [p_ref[_B1 + j] for j in range(6)]
    w2 = [[p_ref[_W2 + k * 4 + j] for j in range(4)] for k in range(6)]
    b2 = [p_ref[_B2 + j] for j in range(4)]
    w3 = [p_ref[_W3 + k] for k in range(4)]
    b3 = p_ref[_B3]

    tr = x_ref.shape[1]
    n_chunks = tr // _CHUNK_ROWS

    def chunk_body(c, carry):
        off = pl.multiple_of(c * _CHUNK_ROWS, _CHUNK_ROWS)

        # Load each of the 8 feature planes for this chunk exactly once.
        xs = [x_ref[k, pl.ds(off, _CHUNK_ROWS), :] for k in range(8)]

        # Layer 1: 8 -> 6
        h1 = []
        for j in range(6):
            acc = xs[0] * w1[0][j]
            for k in range(1, 8):
                acc = acc + xs[k] * w1[k][j]
            h1.append(_sigmoid(acc + b1[j]))

        # Layer 2: 6 -> 4
        h2 = []
        for j in range(4):
            acc = h1[0] * w2[0][j]
            for k in range(1, 6):
                acc = acc + h1[k] * w2[k][j]
            h2.append(_sigmoid(acc + b2[j]))

        # Layer 3: 4 -> 1
        acc = h2[0] * w3[0]
        for k in range(1, 4):
            acc = acc + h2[k] * w3[k]
        o_ref[0, pl.ds(off, _CHUNK_ROWS), :] = _sigmoid(acc + b3)
        return carry

    lax.fori_loop(0, n_chunks, chunk_body, 0, unroll=True)


def _round_up(a, m):
    return (a + m - 1) // m * m


def _choose_tile_rows(rows, block_rows):
    """Largest multiple-of-8 divisor of `rows` that is <= block_rows.

    When rows >= 16 the tile is additionally capped at rows // 2 so the
    'parallel' grid axis has >= 2 steps (keeps both v7x TensorCores busy;
    no-op on single-TC v5e/v6e).
    """
    cap = max(8, (block_rows // 8) * 8)          # guard: multiple of 8
    if rows >= 16:
        cap = min(cap, rows // 2)
    cap = max(cap, 8)
    tr = 8
    for cand in range(16, cap + 1, 8):
        if rows % cand == 0:
            tr = cand
    return tr


def pack_params(w1, b1, w2, b2, w3, b3):
    return jnp.concatenate(
        [w1.reshape(-1), b1.reshape(-1),
         w2.reshape(-1), b2.reshape(-1),
         w3.reshape(-1), b3.reshape(-1)]
    ).astype(jnp.float32)


def mlp_forward(x, params, *, block_rows=64):
    """x: (batch, 8) f32. params: packed (87,) f32. Returns (batch, 1) f32."""
    batch = x.shape[0]

    # Sample b -> (row = b // 128, lane = b % 128). Pad rows only to a multiple
    # of 8 (sublane granularity), not to a tile multiple.
    rows = _round_up(max(pl.cdiv(batch, 128), 1), 8)
    tr = _choose_tile_rows(rows, block_rows)
    padded = rows * 128

    # Single fused pad+transpose pass. For large production batches, produce x
    # upstream directly in this (8, rows, 128) lane-major layout to avoid the
    # extra HBM read+write of x.
    xt = jnp.zeros((8, padded), jnp.float32).at[:, :batch].set(
        x.T.astype(jnp.float32)).reshape(8, rows, 128)

    out = pl.pallas_call(
        mlp_kernel,
        out_shape=jax.ShapeDtypeStruct((1, rows, 128), jnp.float32),
        grid=(rows // tr,),
        in_specs=[
            # All 87 weight/bias scalars live in SMEM (no tiled VMEM blocks).
            pl.BlockSpec(memory_space=pltpu.MemorySpace.SMEM),
            # Streaming, auto-pipelined batch tiles of x.
            pl.BlockSpec((8, tr, 128), lambda i: (0, i, 0)),
        ],
        out_specs=pl.BlockSpec((1, tr, 128), lambda i: (0, i, 0)),
        compiler_params=pltpu.CompilerParams(
            dimension_semantics=("parallel",),
        ),
    )(params, xt)

    return out.reshape(-1)[:batch].reshape(batch, 1)


def init_linear(key, fan_in, fan_out):
    # Mimic PyTorch nn.Linear default init: U(-1/sqrt(fan_in), 1/sqrt(fan_in)).
    kw, kb = jax.random.split(key)
    bound = 1.0 / jnp.sqrt(fan_in)
    w = jax.random.uniform(kw, (fan_in, fan_out), jnp.float32, -bound, bound)
    b = jax.random.uniform(kb, (fan_out,), jnp.float32, -bound, bound)
    return w, b


def _reference(x, w1, b1, w2, b2, w3, b3):
    h = jax.nn.sigmoid(x @ w1 + b1)
    h = jax.nn.sigmoid(h @ w2 + b2)
    return jax.nn.sigmoid(h @ w3 + b3)


if __name__ == "__main__":
    key = jax.random.PRNGKey(0)
    k_x1, k_x2, k1, k2, k3 = jax.random.split(key, 5)

    w1, b1 = init_linear(k1, 8, 6)
    w2, b2 = init_linear(k2, 6, 4)
    w3, b3 = init_linear(k3, 4, 1)
    params = pack_params(w1, b1, w2, b2, w3, b3)

    # Small batch (matches the module's typical use) plus a larger non-aligned
    # batch that exercises minimal padding and a multi-step pipelined grid.
    for k_x, batch in ((k_x1, 8), (k_x2, 5000)):
        x = jax.random.normal(k_x, (batch, 8), jnp.float32)

        out = jax.block_until_ready(mlp_forward(x, params))
        ref = _reference(x, w1, b1, w2, b2, w3, b3)

        assert out.shape == (batch, 1), out.shape
        err = float(jnp.max(jnp.abs(out - ref)))
        assert err < 1e-4, f"mismatch vs reference at batch={batch}: max abs err {err}"

    print("KERNEL_OK")
</pallas_src>

<mosaic_0001>
module attributes {stable_mosaic.version = 11 : i64} {
  func.func @mlp_kernel(%arg0: i32, %arg1: memref<87xf32, #tpu.memory_space<smem>>, %arg2: memref<8x8x128xf32, #tpu.memory_space<vmem>>, %arg3: memref<1x8x128xf32, #tpu.memory_space<vmem>>) attributes {dimension_semantics = [#tpu.dimension_semantics<parallel>], iteration_bounds = array<i64: 1>, scalar_prefetch = 0 : i64, scratch_operands = 0 : i64, tpu.core_type = #tpu.core_type<tc>, window_params = [{transform_indices = @transform_0, window_bounds = array<i64: 87>}, {transform_indices = @transform_1, window_bounds = array<i64: 8, 8, 128>}, {transform_indices = @transform_2, window_bounds = array<i64: 1, 8, 128>}]} {
    %c0 = arith.constant 0 : index
    %0 = memref.load %arg1[%c0] : memref<87xf32, #tpu.memory_space<smem>>
    %c1 = arith.constant 1 : index
    %1 = memref.load %arg1[%c1] : memref<87xf32, #tpu.memory_space<smem>>
    %c2 = arith.constant 2 : index
    %2 = memref.load %arg1[%c2] : memref<87xf32, #tpu.memory_space<smem>>
    %c3 = arith.constant 3 : index
    %3 = memref.load %arg1[%c3] : memref<87xf32, #tpu.memory_space<smem>>
    %c4 = arith.constant 4 : index
    %4 = memref.load %arg1[%c4] : memref<87xf32, #tpu.memory_space<smem>>
    %c5 = arith.constant 5 : index
    %5 = memref.load %arg1[%c5] : memref<87xf32, #tpu.memory_space<smem>>
    %c6 = arith.constant 6 : index
    %6 = memref.load %arg1[%c6] : memref<87xf32, #tpu.memory_space<smem>>
    %c7 = arith.constant 7 : index
    %7 = memref.load %arg1[%c7] : memref<87xf32, #tpu.memory_space<smem>>
    %c8 = arith.constant 8 : index
    %8 = memref.load %arg1[%c8] : memref<87xf32, #tpu.memory_space<smem>>
    %c9 = arith.constant 9 : index
    %9 = memref.load %arg1[%c9] : memref<87xf32, #tpu.memory_space<smem>>
    %c10 = arith.constant 10 : index
    %10 = memref.load %arg1[%c10] : memref<87xf32, #tpu.memory_space<smem>>
    %c11 = arith.constant 11 : index
    %11 = memref.load %arg1[%c11] : memref<87xf32, #tpu.memory_space<smem>>
    %c12 = arith.constant 12 : index
    %12 = memref.load %arg1[%c12] : memref<87xf32, #tpu.memory_space<smem>>
    %c13 = arith.constant 13 : index
    %13 = memref.load %arg1[%c13] : memref<87xf32, #tpu.memory_space<smem>>
    %c14 = arith.constant 14 : index
    %14 = memref.load %arg1[%c14] : memref<87xf32, #tpu.memory_space<smem>>
    %c15 = arith.constant 15 : index
    %15 = memref.load %arg1[%c15] : memref<87xf32, #tpu.memory_space<smem>>
    %c16 = arith.constant 16 : index
    %16 = memref.load %arg1[%c16] : memref<87xf32, #tpu.memory_space<smem>>
    %c17 = arith.constant 17 : index
    %17 = memref.load %arg1[%c17] : memref<87xf32, #tpu.memory_space<smem>>
    %c18 = arith.constant 18 : index
    %18 = memref.load %arg1[%c18] : memref<87xf32, #tpu.memory_space<smem>>
    %c19 = arith.constant 19 : index
    %19 = memref.load %arg1[%c19] : memref<87xf32, #tpu.memory_space<smem>>
    %c20 = arith.constant 20 : index
    %20 = memref.load %arg1[%c20] : memref<87xf32, #tpu.memory_space<smem>>
    %c21 = arith.constant 21 : index
    %21 = memref.load %arg1[%c21] : memref<87xf32, #tpu.memory_space<smem>>
    %c22 = arith.constant 22 : index
    %22 = memref.load %arg1[%c22] : memref<87xf32, #tpu.memory_space<smem>>
    %c23 = arith.constant 23 : index
    %23 = memref.load %arg1[%c23] : memref<87xf32, #tpu.memory_space<smem>>
    %c24 = arith.constant 24 : index
    %24 = memref.load %arg1[%c24] : memref<87xf32, #tpu.memory_space<smem>>
    %c25 = arith.constant 25 : index
    %25 = memref.load %arg1[%c25] : memref<87xf32, #tpu.memory_space<smem>>
    %c26 = arith.constant 26 : index
    %26 = memref.load %arg1[%c26] : memref<87xf32, #tpu.memory_space<smem>>
    %c27 = arith.constant 27 : index
    %27 = memref.load %arg1[%c27] : memref<87xf32, #tpu.memory_space<smem>>
    %c28 = arith.constant 28 : index
    %28 = memref.load %arg1[%c28] : memref<87xf32, #tpu.memory_space<smem>>
    %c29 = arith.constant 29 : index
    %29 = memref.load %arg1[%c29] : memref<87xf32, #tpu.memory_space<smem>>
    %c30 = arith.constant 30 : index
    %30 = memref.load %arg1[%c30] : memref<87xf32, #tpu.memory_space<smem>>
    %c31 = arith.constant 31 : index
    %31 = memref.load %arg1[%c31] : memref<87xf32, #tpu.memory_space<smem>>
    %c32 = arith.constant 32 : index
    %32 = memref.load %arg1[%c32] : memref<87xf32, #tpu.memory_space<smem>>
    %c33 = arith.constant 33 : index
    %33 = memref.load %arg1[%c33] : memref<87xf32, #tpu.memory_space<smem>>
    %c34 = arith.constant 34 : index
    %34 = memref.load %arg1[%c34] : memref<87xf32, #tpu.memory_space<smem>>
    %c35 = arith.constant 35 : index
    %35 = memref.load %arg1[%c35] : memref<87xf32, #tpu.memory_space<smem>>
    %c36 = arith.constant 36 : index
    %36 = memref.load %arg1[%c36] : memref<87xf32, #tpu.memory_space<smem>>
    %c37 = arith.constant 37 : index
    %37 = memref.load %arg1[%c37] : memref<87xf32, #tpu.memory_space<smem>>
    %c38 = arith.constant 38 : index
    %38 = memref.load %arg1[%c38] : memref<87xf32, #tpu.memory_space<smem>>
    %c39 = arith.constant 39 : index
    %39 = memref.load %arg1[%c39] : memref<87xf32, #tpu.memory_space<smem>>
    %c40 = arith.constant 40 : index
    %40 = memref.load %arg1[%c40] : memref<87xf32, #tpu.memory_space<smem>>
    %c41 = arith.constant 41 : index
    %41 = memref.load %arg1[%c41] : memref<87xf32, #tpu.memory_space<smem>>
    %c42 = arith.constant 42 : index
    %42 = memref.load %arg1[%c42] : memref<87xf32, #tpu.memory_space<smem>>
    %c43 = arith.constant 43 : index
    %43 = memref.load %arg1[%c43] : memref<87xf32, #tpu.memory_space<smem>>
    %c44 = arith.constant 44 : index
    %44 = memref.load %arg1[%c44] : memref<87xf32, #tpu.memory_space<smem>>
    %c45 = arith.constant 45 : index
    %45 = memref.load %arg1[%c45] : memref<87xf32, #tpu.memory_space<smem>>
    %c46 = arith.constant 46 : index
    %46 = memref.load %arg1[%c46] : memref<87xf32, #tpu.memory_space<smem>>
    %c47 = arith.constant 47 : index
    %47 = memref.load %arg1[%c47] : memref<87xf32, #tpu.memory_space<smem>>
    %c48 = arith.constant 48 : index
    %48 = memref.load %arg1[%c48] : memref<87xf32, #tpu.memory_space<smem>>
    %c49 = arith.constant 49 : index
    %49 = memref.load %arg1[%c49] : memref<87xf32, #tpu.memory_space<smem>>
    %c50 = arith.constant 50 : index
    %50 = memref.load %arg1[%c50] : memref<87xf32, #tpu.memory_space<smem>>
    %c51 = arith.constant 51 : index
    %51 = memref.load %arg1[%c51] : memref<87xf32, #tpu.memory_space<smem>>
    %c52 = arith.constant 52 : index
    %52 = memref.load %arg1[%c52] : memref<87xf32, #tpu.memory_space<smem>>
    %c53 = arith.constant 53 : index
    %53 = memref.load %arg1[%c53] : memref<87xf32, #tpu.memory_space<smem>>
    %c54 = arith.constant 54 : index
    %54 = memref.load %arg1[%c54] : memref<87xf32, #tpu.memory_space<smem>>
    %c55 = arith.constant 55 : index
    %55 = memref.load %arg1[%c55] : memref<87xf32, #tpu.memory_space<smem>>
    %c56 = arith.constant 56 : index
    %56 = memref.load %arg1[%c56] : memref<87xf32, #tpu.memory_space<smem>>
    %c57 = arith.constant 57 : index
    %57 = memref.load %arg1[%c57] : memref<87xf32, #tpu.memory_space<smem>>
    %c58 = arith.constant 58 : index
    %58 = memref.load %arg1[%c58] : memref<87xf32, #tpu.memory_space<smem>>
    %c59 = arith.constant 59 : index
    %59 = memref.load %arg1[%c59] : memref<87xf32, #tpu.memory_space<smem>>
    %c60 = arith.constant 60 : index
    %60 = memref.load %arg1[%c60] : memref<87xf32, #tpu.memory_space<smem>>
    %c61 = arith.constant 61 : index
    %61 = memref.load %arg1[%c61] : memref<87xf32, #tpu.memory_space<smem>>
    %c62 = arith.constant 62 : index
    %62 = memref.load %arg1[%c62] : memref<87xf32, #tpu.memory_space<smem>>
    %c63 = arith.constant 63 : index
    %63 = memref.load %arg1[%c63] : memref<87xf32, #tpu.memory_space<smem>>
    %c64 = arith.constant 64 : index
    %64 = memref.load %arg1[%c64] : memref<87xf32, #tpu.memory_space<smem>>
    %c65 = arith.constant 65 : index
    %65 = memref.load %arg1[%c65] : memref<87xf32, #tpu.memory_space<smem>>
    %c66 = arith.constant 66 : index
    %66 = memref.load %arg1[%c66] : memref<87xf32, #tpu.memory_space<smem>>
    %c67 = arith.constant 67 : index
    %67 = memref.load %arg1[%c67] : memref<87xf32, #tpu.memory_space<smem>>
    %c68 = arith.constant 68 : index
    %68 = memref.load %arg1[%c68] : memref<87xf32, #tpu.memory_space<smem>>
    %c69 = arith.constant 69 : index
    %69 = memref.load %arg1[%c69] : memref<87xf32, #tpu.memory_space<smem>>
    %c70 = arith.constant 70 : index
    %70 = memref.load %arg1[%c70] : memref<87xf32, #tpu.memory_space<smem>>
    %c71 = arith.constant 71 : index
    %71 = memref.load %arg1[%c71] : memref<87xf32, #tpu.memory_space<smem>>
    %c72 = arith.constant 72 : index
    %72 = memref.load %arg1[%c72] : memref<87xf32, #tpu.memory_space<smem>>
    %c73 = arith.constant 73 : index
    %73 = memref.load %arg1[%c73] : memref<87xf32, #tpu.memory_space<smem>>
    %c74 = arith.constant 74 : index
    %74 = memref.load %arg1[%c74] : memref<87xf32, #tpu.memory_space<smem>>
    %c75 = arith.constant 75 : index
    %75 = memref.load %arg1[%c75] : memref<87xf32, #tpu.memory_space<smem>>
    %c76 = arith.constant 76 : index
    %76 = memref.load %arg1[%c76] : memref<87xf32, #tpu.memory_space<smem>>
    %c77 = arith.constant 77 : index
    %77 = memref.load %arg1[%c77] : memref<87xf32, #tpu.memory_space<smem>>
    %c78 = arith.constant 78 : index
    %78 = memref.load %arg1[%c78] : memref<87xf32, #tpu.memory_space<smem>>
    %c79 = arith.constant 79 : index
    %79 = memref.load %arg1[%c79] : memref<87xf32, #tpu.memory_space<smem>>
    %c80 = arith.constant 80 : index
    %80 = memref.load %arg1[%c80] : memref<87xf32, #tpu.memory_space<smem>>
    %c81 = arith.constant 81 : index
    %81 = memref.load %arg1[%c81] : memref<87xf32, #tpu.memory_space<smem>>
    %c82 = arith.constant 82 : index
    %82 = memref.load %arg1[%c82] : memref<87xf32, #tpu.memory_space<smem>>
    %c83 = arith.constant 83 : index
    %83 = memref.load %arg1[%c83] : memref<87xf32, #tpu.memory_space<smem>>
    %c84 = arith.constant 84 : index
    %84 = memref.load %arg1[%c84] : memref<87xf32, #tpu.memory_space<smem>>
    %c85 = arith.constant 85 : index
    %85 = memref.load %arg1[%c85] : memref<87xf32, #tpu.memory_space<smem>>
    %c86 = arith.constant 86 : index
    %86 = memref.load %arg1[%c86] : memref<87xf32, #tpu.memory_space<smem>>
    %c0_i32 = arith.constant 0 : i32
    %c8_i32 = arith.constant 8 : i32
    %87 = arith.muli %c0_i32, %c8_i32 : i32
    %88 = tpu.assume_multiple %87, 8 : i32
    %c0_0 = arith.constant 0 : index
    %89 = arith.index_cast %88 : i32 to index
    %c0_1 = arith.constant 0 : index
    %90 = vector.load %arg2[%c0_0, %89, %c0_1] : memref<8x8x128xf32, #tpu.memory_space<vmem>>, vector<1x8x128xf32>
    %91 = vector.shape_cast %90 : vector<1x8x128xf32> to vector<8x128xf32>
    %c1_2 = arith.constant 1 : index
    %92 = arith.index_cast %88 : i32 to index
    %c0_3 = arith.constant 0 : index
    %93 = vector.load %arg2[%c1_2, %92, %c0_3] : memref<8x8x128xf32, #tpu.memory_space<vmem>>, vector<1x8x128xf32>
    %94 = vector.shape_cast %93 : vector<1x8x128xf32> to vector<8x128xf32>
    %c2_4 = arith.constant 2 : index
    %95 = arith.index_cast %88 : i32 to index
    %c0_5 = arith.constant 0 : index
    %96 = vector.load %arg2[%c2_4, %95, %c0_5] : memref<8x8x128xf32, #tpu.memory_space<vmem>>, vector<1x8x128xf32>
    %97 = vector.shape_cast %96 : vector<1x8x128xf32> to vector<8x128xf32>
    %c3_6 = arith.constant 3 : index
    %98 = arith.index_cast %88 : i32 to index
    %c0_7 = arith.constant 0 : index
    %99 = vector.load %arg2[%c3_6, %98, %c0_7] : memref<8x8x128xf32, #tpu.memory_space<vmem>>, vector<1x8x128xf32>
    %100 = vector.shape_cast %99 : vector<1x8x128xf32> to vector<8x128xf32>
    %c4_8 = arith.constant 4 : index
    %101 = arith.index_cast %88 : i32 to index
    %c0_9 = arith.constant 0 : index
    %102 = vector.load %arg2[%c4_8, %101, %c0_9] : memref<8x8x128xf32, #tpu.memory_space<vmem>>, vector<1x8x128xf32>
    %103 = vector.shape_cast %102 : vector<1x8x128xf32> to vector<8x128xf32>
    %c5_10 = arith.constant 5 : index
    %104 = arith.index_cast %88 : i32 to index
    %c0_11 = arith.constant 0 : index
    %105 = vector.load %arg2[%c5_10, %104, %c0_11] : memref<8x8x128xf32, #tpu.memory_space<vmem>>, vector<1x8x128xf32>
    %106 = vector.shape_cast %105 : vector<1x8x128xf32> to vector<8x128xf32>
    %c6_12 = arith.constant 6 : index
    %107 = arith.index_cast %88 : i32 to index
    %c0_13 = arith.constant 0 : index
    %108 = vector.load %arg2[%c6_12, %107, %c0_13] : memref<8x8x128xf32, #tpu.memory_space<vmem>>, vector<1x8x128xf32>
    %109 = vector.shape_cast %108 : vector<1x8x128xf32> to vector<8x128xf32>
    %c7_14 = arith.constant 7 : index
    %110 = arith.index_cast %88 : i32 to index
    %c0_15 = arith.constant 0 : index
    %111 = vector.load %arg2[%c7_14, %110, %c0_15] : memref<8x8x128xf32, #tpu.memory_space<vmem>>, vector<1x8x128xf32>
    %112 = vector.shape_cast %111 : vector<1x8x128xf32> to vector<8x128xf32>
    %113 = vector.broadcast %0 : f32 to vector<8x128xf32>
    %114 = arith.mulf %91, %113 : vector<8x128xf32>
    %115 = vector.broadcast %6 : f32 to vector<8x128xf32>
    %116 = arith.mulf %94, %115 : vector<8x128xf32>
    %117 = arith.addf %114, %116 : vector<8x128xf32>
    %118 = vector.broadcast %12 : f32 to vector<8x128xf32>
    %119 = arith.mulf %97, %118 : vector<8x128xf32>
    %120 = arith.addf %117, %119 : vector<8x128xf32>
    %121 = vector.broadcast %18 : f32 to vector<8x128xf32>
    %122 = arith.mulf %100, %121 : vector<8x128xf32>
    %123 = arith.addf %120, %122 : vector<8x128xf32>
    %124 = vector.broadcast %24 : f32 to vector<8x128xf32>
    %125 = arith.mulf %103, %124 : vector<8x128xf32>
    %126 = arith.addf %123, %125 : vector<8x128xf32>
    %127 = vector.broadcast %30 : f32 to vector<8x128xf32>
    %128 = arith.mulf %106, %127 : vector<8x128xf32>
    %129 = arith.addf %126, %128 : vector<8x128xf32>
    %130 = vector.broadcast %36 : f32 to vector<8x128xf32>
    %131 = arith.mulf %109, %130 : vector<8x128xf32>
    %132 = arith.addf %129, %131 : vector<8x128xf32>
    %133 = vector.broadcast %42 : f32 to vector<8x128xf32>
    %134 = arith.mulf %112, %133 : vector<8x128xf32>
    %135 = arith.addf %132, %134 : vector<8x128xf32>
    %136 = vector.broadcast %48 : f32 to vector<8x128xf32>
    %137 = arith.addf %135, %136 : vector<8x128xf32>
    %cst = arith.constant 5.000000e-01 : f32
    %138 = vector.broadcast %cst : f32 to vector<8x128xf32>
    %139 = arith.mulf %138, %137 : vector<8x128xf32>
    %140 = math.tanh %139 : vector<8x128xf32>
    %cst_16 = arith.constant 5.000000e-01 : f32
    %141 = vector.broadcast %cst_16 : f32 to vector<8x128xf32>
    %142 = arith.mulf %141, %140 : vector<8x128xf32>
    %cst_17 = arith.constant 5.000000e-01 : f32
    %143 = vector.broadcast %cst_17 : f32 to vector<8x128xf32>
    %144 = arith.addf %143, %142 : vector<8x128xf32>
    %145 = vector.broadcast %1 : f32 to vector<8x128xf32>
    %146 = arith.mulf %91, %145 : vector<8x128xf32>
    %147 = vector.broadcast %7 : f32 to vector<8x128xf32>
    %148 = arith.mulf %94, %147 : vector<8x128xf32>
    %149 = arith.addf %146, %148 : vector<8x128xf32>
    %150 = vector.broadcast %13 : f32 to vector<8x128xf32>
    %151 = arith.mulf %97, %150 : vector<8x128xf32>
    %152 = arith.addf %149, %151 : vector<8x128xf32>
    %153 = vector.broadcast %19 : f32 to vector<8x128xf32>
    %154 = arith.mulf %100, %153 : vector<8x128xf32>
    %155 = arith.addf %152, %154 : vector<8x128xf32>
    %156 = vector.broadcast %25 : f32 to vector<8x128xf32>
    %157 = arith.mulf %103, %156 : vector<8x128xf32>
    %158 = arith.addf %155, %157 : vector<8x128xf32>
    %159 = vector.broadcast %31 : f32 to vector<8x128xf32>
    %160 = arith.mulf %106, %159 : vector<8x128xf32>
    %161 = arith.addf %158, %160 : vector<8x128xf32>
    %162 = vector.broadcast %37 : f32 to vector<8x128xf32>
    %163 = arith.mulf %109, %162 : vector<8x128xf32>
    %164 = arith.addf %161, %163 : vector<8x128xf32>
    %165 = vector.broadcast %43 : f32 to vector<8x128xf32>
    %166 = arith.mulf %112, %165 : vector<8x128xf32>
    %167 = arith.addf %164, %166 : vector<8x128xf32>
    %168 = vector.broadcast %49 : f32 to vector<8x128xf32>
    %169 = arith.addf %167, %168 : vector<8x128xf32>
    %cst_18 = arith.constant 5.000000e-01 : f32
    %170 = vector.broadcast %cst_18 : f32 to vector<8x128xf32>
    %171 = arith.mulf %170, %169 : vector<8x128xf32>
    %172 = math.tanh %171 : vector<8x128xf32>
    %cst_19 = arith.constant 5.000000e-01 : f32
    %173 = vector.broadcast %cst_19 : f32 to vector<8x128xf32>
    %174 = arith.mulf %173, %172 : vector<8x128xf32>
    %cst_20 = arith.constant 5.000000e-01 : f32
    %175 = vector.broadcast %cst_20 : f32 to vector<8x128xf32>
    %176 = arith.addf %175, %174 : vector<8x128xf32>
    %177 = vector.broadcast %2 : f32 to vector<8x128xf32>
    %178 = arith.mulf %91, %177 : vector<8x128xf32>
    %179 = vector.broadcast %8 : f32 to vector<8x128xf32>
    %180 = arith.mulf %94, %179 : vector<8x128xf32>
    %181 = arith.addf %178, %180 : vector<8x128xf32>
    %182 = vector.broadcast %14 : f32 to vector<8x128xf32>
    %183 = arith.mulf %97, %182 : vector<8x128xf32>
    %184 = arith.addf %181, %183 : vector<8x128xf32>
    %185 = vector.broadcast %20 : f32 to vector<8x128xf32>
    %186 = arith.mulf %100, %185 : vector<8x128xf32>
    %187 = arith.addf %184, %186 : vector<8x128xf32>
    %188 = vector.broadcast %26 : f32 to vector<8x128xf32>
    %189 = arith.mulf %103, %188 : vector<8x128xf32>
    %190 = arith.addf %187, %189 : vector<8x128xf32>
    %191 = vector.broadcast %32 : f32 to vector<8x128xf32>
    %192 = arith.mulf %106, %191 : vector<8x128xf32>
    %193 = arith.addf %190, %192 : vector<8x128xf32>
    %194 = vector.broadcast %38 : f32 to vector<8x128xf32>
    %195 = arith.mulf %109, %194 : vector<8x128xf32>
    %196 = arith.addf %193, %195 : vector<8x128xf32>
    %197 = vector.broadcast %44 : f32 to vector<8x128xf32>
    %198 = arith.mulf %112, %197 : vector<8x128xf32>
    %199 = arith.addf %196, %198 : vector<8x128xf32>
    %200 = vector.broadcast %50 : f32 to vector<8x128xf32>
    %201 = arith.addf %199, %200 : vector<8x128xf32>
    %cst_21 = arith.constant 5.000000e-01 : f32
    %202 = vector.broadcast %cst_21 : f32 to vector<8x128xf32>
    %203 = arith.mulf %202, %201 : vector<8x128xf32>
    %204 = math.tanh %203 : vector<8x128xf32>
    %cst_22 = arith.constant 5.000000e-01 : f32
    %205 = vector.broadcast %cst_22 : f32 to vector<8x128xf32>
    %206 = arith.mulf %205, %204 : vector<8x128xf32>
    %cst_23 = arith.constant 5.000000e-01 : f32
    %207 = vector.broadcast %cst_23 : f32 to vector<8x128xf32>
    %208 = arith.addf %207, %206 : vector<8x128xf32>
    %209 = vector.broadcast %3 : f32 to vector<8x128xf32>
    %210 = arith.mulf %91, %209 : vector<8x128xf32>
    %211 = vector.broadcast %9 : f32 to vector<8x128xf32>
    %212 = arith.mulf %94, %211 : vector<8x128xf32>
    %213 = arith.addf %210, %212 : vector<8x128xf32>
    %214 = vector.broadcast %15 : f32 to vector<8x128xf32>
    %215 = arith.mulf %97, %214 : vector<8x128xf32>
    %216 = arith.addf %213, %215 : vector<8x128xf32>
    %217 = vector.broadcast %21 : f32 to vector<8x128xf32>
    %218 = arith.mulf %100, %217 : vector<8x128xf32>
    %219 = arith.addf %216, %218 : vector<8x128xf32>
    %220 = vector.broadcast %27 : f32 to vector<8x128xf32>
    %221 = arith.mulf %103, %220 : vector<8x128xf32>
    %222 = arith.addf %219, %221 : vector<8x128xf32>
    %223 = vector.broadcast %33 : f32 to vector<8x128xf32>
    %224 = arith.mulf %106, %223 : vector<8x128xf32>
    %225 = arith.addf %222, %224 : vector<8x128xf32>
    %226 = vector.broadcast %39 : f32 to vector<8x128xf32>
    %227 = arith.mulf %109, %226 : vector<8x128xf32>
    %228 = arith.addf %225, %227 : vector<8x128xf32>
    %229 = vector.broadcast %45 : f32 to vector<8x128xf32>
    %230 = arith.mulf %112, %229 : vector<8x128xf32>
    %231 = arith.addf %228, %230 : vector<8x128xf32>
    %232 = vector.broadcast %51 : f32 to vector<8x128xf32>
    %233 = arith.addf %231, %232 : vector<8x128xf32>
    %cst_24 = arith.constant 5.000000e-01 : f32
    %234 = vector.broadcast %cst_24 : f32 to vector<8x128xf32>
    %235 = arith.mulf %234, %233 : vector<8x128xf32>
    %236 = math.tanh %235 : vector<8x128xf32>
    %cst_25 = arith.constant 5.000000e-01 : f32
    %237 = vector.broadcast %cst_25 : f32 to vector<8x128xf32>
    %238 = arith.mulf %237, %236 : vector<8x128xf32>
    %cst_26 = arith.constant 5.000000e-01 : f32
    %239 = vector.broadcast %cst_26 : f32 to vector<8x128xf32>
    %240 = arith.addf %239, %238 : vector<8x128xf32>
    %241 = vector.broadcast %4 : f32 to vector<8x128xf32>
    %242 = arith.mulf %91, %241 : vector<8x128xf32>
    %243 = vector.broadcast %10 : f32 to vector<8x128xf32>
    %244 = arith.mulf %94, %243 : vector<8x128xf32>
    %245 = arith.addf %242, %244 : vector<8x128xf32>
    %246 = vector.broadcast %16 : f32 to vector<8x128xf32>
    %247 = arith.mulf %97, %246 : vector<8x128xf32>
    %248 = arith.addf %245, %247 : vector<8x128xf32>
    %249 = vector.broadcast %22 : f32 to vector<8x128xf32>
    %250 = arith.mulf %100, %249 : vector<8x128xf32>
    %251 = arith.addf %248, %250 : vector<8x128xf32>
    %252 = vector.broadcast %28 : f32 to vector<8x128xf32>
    %253 = arith.mulf %103, %252 : vector<8x128xf32>
    %254 = arith.addf %251, %253 : vector<8x128xf32>
    %255 = vector.broadcast %34 : f32 to vector<8x128xf32>
    %256 = arith.mulf %106, %255 : vector<8x128xf32>
    %257 = arith.addf %254, %256 : vector<8x128xf32>
    %258 = vector.broadcast %40 : f32 to vector<8x128xf32>
    %259 = arith.mulf %109, %258 : vector<8x128xf32>
    %260 = arith.addf %257, %259 : vector<8x128xf32>
    %261 = vector.broadcast %46 : f32 to vector<8x128xf32>
    %262 = arith.mulf %112, %261 : vector<8x128xf32>
    %263 = arith.addf %260, %262 : vector<8x128xf32>
    %264 = vector.broadcast %52 : f32 to vector<8x128xf32>
    %265 = arith.addf %263, %264 : vector<8x128xf32>
    %cst_27 = arith.constant 5.000000e-01 : f32
    %266 = vector.broadcast %cst_27 : f32 to vector<8x128xf32>
    %267 = arith.mulf %266, %265 : vector<8x128xf32>
    %268 = math.tanh %267 : vector<8x128xf32>
    %cst_28 = arith.constant 5.000000e-01 : f32
    %269 = vector.broadcast %cst_28 : f32 to vector<8x128xf32>
    %270 = arith.mulf %269, %268 : vector<8x128xf32>
    %cst_29 = arith.constant 5.000000e-01 : f32
    %271 = vector.broadcast %cst_29 : f32 to vector<8x128xf32>
    %272 = arith.addf %271, %270 : vector<8x128xf32>
    %273 = vector.broadcast %5 : f32 to vector<8x128xf32>
    %274 = arith.mulf %91, %273 : vector<8x128xf32>
    %275 = vector.broadcast %11 : f32 to vector<8x128xf32>
    %276 = arith.mulf %94, %275 : vector<8x128xf32>
    %277 = arith.addf %274, %276 : vector<8x128xf32>
    %278 = vector.broadcast %17 : f32 to vector<8x128xf32>
    %279 = arith.mulf %97, %278 : vector<8x128xf32>
    %280 = arith.addf %277, %279 : vector<8x128xf32>
    %281 = vector.broadcast %23 : f32 to vector<8x128xf32>
    %282 = arith.mulf %100, %281 : vector<8x128xf32>
    %283 = arith.addf %280, %282 : vector<8x128xf32>
    %284 = vector.broadcast %29 : f32 to vector<8x128xf32>
    %285 = arith.mulf %103, %284 : vector<8x128xf32>
    %286 = arith.addf %283, %285 : vector<8x128xf32>
    %287 = vector.broadcast %35 : f32 to vector<8x128xf32>
    %288 = arith.mulf %106, %287 : vector<8x128xf32>
    %289 = arith.addf %286, %288 : vector<8x128xf32>
    %290 = vector.broadcast %41 : f32 to vector<8x128xf32>
    %291 = arith.mulf %109, %290 : vector<8x128xf32>
    %292 = arith.addf %289, %291 : vector<8x128xf32>
    %293 = vector.broadcast %47 : f32 to vector<8x128xf32>
    %294 = arith.mulf %112, %293 : vector<8x128xf32>
    %295 = arith.addf %292, %294 : vector<8x128xf32>
    %296 = vector.broadcast %53 : f32 to vector<8x128xf32>
    %297 = arith.addf %295, %296 : vector<8x128xf32>
    %cst_30 = arith.constant 5.000000e-01 : f32
    %298 = vector.broadcast %cst_30 : f32 to vector<8x128xf32>
    %299 = arith.mulf %298, %297 : vector<8x128xf32>
    %300 = math.tanh %299 : vector<8x128xf32>
    %cst_31 = arith.constant 5.000000e-01 : f32
    %301 = vector.broadcast %cst_31 : f32 to vector<8x128xf32>
    %302 = arith.mulf %301, %300 : vector<8x128xf32>
    %cst_32 = arith.constant 5.000000e-01 : f32
    %303 = vector.broadcast %cst_32 : f32 to vector<8x128xf32>
    %304 = arith.addf %303, %302 : vector<8x128xf32>
    %305 = vector.broadcast %54 : f32 to vector<8x128xf32>
    %306 = arith.mulf %144, %305 : vector<8x128xf32>
    %307 = vector.broadcast %58 : f32 to vector<8x128xf32>
    %308 = arith.mulf %176, %307 : vector<8x128xf32>
    %309 = arith.addf %306, %308 : vector<8x128xf32>
    %310 = vector.broadcast %62 : f32 to vector<8x128xf32>
    %311 = arith.mulf %208, %310 : vector<8x128xf32>
    %312 = arith.addf %309, %311 : vector<8x128xf32>
    %313 = vector.broadcast %66 : f32 to vector<8x128xf32>
    %314 = arith.mulf %240, %313 : vector<8x128xf32>
    %315 = arith.addf %312, %314 : vector<8x128xf32>
    %316 = vector.broadcast %70 : f32 to vector<8x128xf32>
    %317 = arith.mulf %272, %316 : vector<8x128xf32>
    %318 = arith.addf %315, %317 : vector<8x128xf32>
    %319 = vector.broadcast %74 : f32 to vector<8x128xf32>
    %320 = arith.mulf %304, %319 : vector<8x128xf32>
    %321 = arith.addf %318, %320 : vector<8x128xf32>
    %322 = vector.broadcast %78 : f32 to vector<8x128xf32>
    %323 = arith.addf %321, %322 : vector<8x128xf32>
    %cst_33 = arith.constant 5.000000e-01 : f32
    %324 = vector.broadcast %cst_33 : f32 to vector<8x128xf32>
    %325 = arith.mulf %324, %323 : vector<8x128xf32>
    %326 = math.tanh %325 : vector<8x128xf32>
    %cst_34 = arith.constant 5.000000e-01 : f32
    %327 = vector.broadcast %cst_34 : f32 to vector<8x128xf32>
    %328 = arith.mulf %327, %326 : vector<8x128xf32>
    %cst_35 = arith.constant 5.000000e-01 : f32
    %329 = vector.broadcast %cst_35 : f32 to vector<8x128xf32>
    %330 = arith.addf %329, %328 : vector<8x128xf32>
    %331 = vector.broadcast %55 : f32 to vector<8x128xf32>
    %332 = arith.mulf %144, %331 : vector<8x128xf32>
    %333 = vector.broadcast %59 : f32 to vector<8x128xf32>
    %334 = arith.mulf %176, %333 : vector<8x128xf32>
    %335 = arith.addf %332, %334 : vector<8x128xf32>
    %336 = vector.broadcast %63 : f32 to vector<8x128xf32>
    %337 = arith.mulf %208, %336 : vector<8x128xf32>
    %338 = arith.addf %335, %337 : vector<8x128xf32>
    %339 = vector.broadcast %67 : f32 to vector<8x128xf32>
    %340 = arith.mulf %240, %339 : vector<8x128xf32>
    %341 = arith.addf %338, %340 : vector<8x128xf32>
    %342 = vector.broadcast %71 : f32 to vector<8x128xf32>
    %343 = arith.mulf %272, %342 : vector<8x128xf32>
    %344 = arith.addf %341, %343 : vector<8x128xf32>
    %345 = vector.broadcast %75 : f32 to vector<8x128xf32>
    %346 = arith.mulf %304, %345 : vector<8x128xf32>
    %347 = arith.addf %344, %346 : vector<8x128xf32>
    %348 = vector.broadcast %79 : f32 to vector<8x128xf32>
    %349 = arith.addf %347, %348 : vector<8x128xf32>
    %cst_36 = arith.constant 5.000000e-01 : f32
    %350 = vector.broadcast %cst_36 : f32 to vector<8x128xf32>
    %351 = arith.mulf %350, %349 : vector<8x128xf32>
    %352 = math.tanh %351 : vector<8x128xf32>
    %cst_37 = arith.constant 5.000000e-01 : f32
    %353 = vector.broadcast %cst_37 : f32 to vector<8x128xf32>
    %354 = arith.mulf %353, %352 : vector<8x128xf32>
    %cst_38 = arith.constant 5.000000e-01 : f32
    %355 = vector.broadcast %cst_38 : f32 to vector<8x128xf32>
    %356 = arith.addf %355, %354 : vector<8x128xf32>
    %357 = vector.broadcast %56 : f32 to vector<8x128xf32>
    %358 = arith.mulf %144, %357 : vector<8x128xf32>
    %359 = vector.broadcast %60 : f32 to vector<8x128xf32>
    %360 = arith.mulf %176, %359 : vector<8x128xf32>
    %361 = arith.addf %358, %360 : vector<8x128xf32>
    %362 = vector.broadcast %64 : f32 to vector<8x128xf32>
    %363 = arith.mulf %208, %362 : vector<8x128xf32>
    %364 = arith.addf %361, %363 : vector<8x128xf32>
    %365 = vector.broadcast %68 : f32 to vector<8x128xf32>
    %366 = arith.mulf %240, %365 : vector<8x128xf32>
    %367 = arith.addf %364, %366 : vector<8x128xf32>
    %368 = vector.broadcast %72 : f32 to vector<8x128xf32>
    %369 = arith.mulf %272, %368 : vector<8x128xf32>
    %370 = arith.addf %367, %369 : vector<8x128xf32>
    %371 = vector.broadcast %76 : f32 to vector<8x128xf32>
    %372 = arith.mulf %304, %371 : vector<8x128xf32>
    %373 = arith.addf %370, %372 : vector<8x128xf32>
    %374 = vector.broadcast %80 : f32 to vector<8x128xf32>
    %375 = arith.addf %373, %374 : vector<8x128xf32>
    %cst_39 = arith.constant 5.000000e-01 : f32
    %376 = vector.broadcast %cst_39 : f32 to vector<8x128xf32>
    %377 = arith.mulf %376, %375 : vector<8x128xf32>
    %378 = math.tanh %377 : vector<8x128xf32>
    %cst_40 = arith.constant 5.000000e-01 : f32
    %379 = vector.broadcast %cst_40 : f32 to vector<8x128xf32>
    %380 = arith.mulf %379, %378 : vector<8x128xf32>
    %cst_41 = arith.constant 5.000000e-01 : f32
    %381 = vector.broadcast %cst_41 : f32 to vector<8x128xf32>
    %382 = arith.addf %381, %380 : vector<8x128xf32>
    %383 = vector.broadcast %57 : f32 to vector<8x128xf32>
    %384 = arith.mulf %144, %383 : vector<8x128xf32>
    %385 = vector.broadcast %61 : f32 to vector<8x128xf32>
    %386 = arith.mulf %176, %385 : vector<8x128xf32>
    %387 = arith.addf %384, %386 : vector<8x128xf32>
    %388 = vector.broadcast %65 : f32 to vector<8x128xf32>
    %389 = arith.mulf %208, %388 : vector<8x128xf32>
    %390 = arith.addf %387, %389 : vector<8x128xf32>
    %391 = vector.broadcast %69 : f32 to vector<8x128xf32>
    %392 = arith.mulf %240, %391 : vector<8x128xf32>
    %393 = arith.addf %390, %392 : vector<8x128xf32>
    %394 = vector.broadcast %73 : f32 to vector<8x128xf32>
    %395 = arith.mulf %272, %394 : vector<8x128xf32>
    %396 = arith.addf %393, %395 : vector<8x128xf32>
    %397 = vector.broadcast %77 : f32 to vector<8x128xf32>
    %398 = arith.mulf %304, %397 : vector<8x128xf32>
    %399 = arith.addf %396, %398 : vector<8x128xf32>
    %400 = vector.broadcast %81 : f32 to vector<8x128xf32>
    %401 = arith.addf %399, %400 : vector<8x128xf32>
    %cst_42 = arith.constant 5.000000e-01 : f32
    %402 = vector.broadcast %cst_42 : f32 to vector<8x128xf32>
    %403 = arith.mulf %402, %401 : vector<8x128xf32>
    %404 = math.tanh %403 : vector<8x128xf32>
    %cst_43 = arith.constant 5.000000e-01 : f32
    %405 = vector.broadcast %cst_43 : f32 to vector<8x128xf32>
    %406 = arith.mulf %405, %404 : vector<8x128xf32>
    %cst_44 = arith.constant 5.000000e-01 : f32
    %407 = vector.broadcast %cst_44 : f32 to vector<8x128xf32>
    %408 = arith.addf %407, %406 : vector<8x128xf32>
    %409 = vector.broadcast %82 : f32 to vector<8x128xf32>
    %410 = arith.mulf %330, %409 : vector<8x128xf32>
    %411 = vector.broadcast %83 : f32 to vector<8x128xf32>
    %412 = arith.mulf %356, %411 : vector<8x128xf32>
    %413 = arith.addf %410, %412 : vector<8x128xf32>
    %414 = vector.broadcast %84 : f32 to vector<8x128xf32>
    %415 = arith.mulf %382, %414 : vector<8x128xf32>
    %416 = arith.addf %413, %415 : vector<8x128xf32>
    %417 = vector.broadcast %85 : f32 to vector<8x128xf32>
    %418 = arith.mulf %408, %417 : vector<8x128xf32>
    %419 = arith.addf %416, %418 : vector<8x128xf32>
    %420 = vector.broadcast %86 : f32 to vector<8x128xf32>
    %421 = arith.addf %419, %420 : vector<8x128xf32>
    %cst_45 = arith.constant 5.000000e-01 : f32
    %422 = vector.broadcast %cst_45 : f32 to vector<8x128xf32>
    %423 = arith.mulf %422, %421 : vector<8x128xf32>
    %424 = math.tanh %423 : vector<8x128xf32>
    %cst_46 = arith.constant 5.000000e-01 : f32
    %425 = vector.broadcast %cst_46 : f32 to vector<8x128xf32>
    %426 = arith.mulf %425, %424 : vector<8x128xf32>
    %cst_47 = arith.constant 5.000000e-01 : f32
    %427 = vector.broadcast %cst_47 : f32 to vector<8x128xf32>
    %428 = arith.addf %427, %426 : vector<8x128xf32>
    %c0_48 = arith.constant 0 : index
    %429 = arith.index_cast %88 : i32 to index
    %c0_49 = arith.constant 0 : index
    %430 = vector.load %arg3[%c0_48, %429, %c0_49] : memref<1x8x128xf32, #tpu.memory_space<vmem>>, vector<1x8x128xf32>
    %431 = vector.shape_cast %430 : vector<1x8x128xf32> to vector<8x128xf32>
    %432 = vector.shape_cast %428 : vector<8x128xf32> to vector<1x8x128xf32>
    tpu.vector_store %arg3[%c0_48, %429, %c0_49], %432 {strides = array<i32>} : memref<1x8x128xf32, #tpu.memory_space<vmem>>, vector<1x8x128xf32>,
    %c1_i32 = arith.constant 1 : i32
    return
  }
  func.func @transform_0(%arg0: i32) -> i32 {
    %c0_i32 = arith.constant 0 : i32
    %c0_i32_0 = arith.constant 0 : i32
    return %c0_i32 : i32
  }
  func.func @transform_1(%arg0: i32) -> (i32, i32, i32) {
    %c0_i32 = arith.constant 0 : i32
    %c0_i32_0 = arith.constant 0 : i32
    %c0_i32_1 = arith.constant 0 : i32
    return %c0_i32, %arg0, %c0_i32_0 : i32, i32, i32
  }
  func.func @transform_2(%arg0: i32) -> (i32, i32, i32) {
    %c0_i32 = arith.constant 0 : i32
    %c0_i32_0 = arith.constant 0 : i32
    %c0_i32_1 = arith.constant 0 : i32
    return %c0_i32, %arg0, %c0_i32_0 : i32, i32, i32
  }
}

</mosaic_0001>

<bundles_post_ra>
// kernel: tpu_custom_call.1
= control target key start
LH: loop header
LB: loop body
LE: loop exit
PB: predicated region body
PF: predicated region fallthrough
CT: control target
= control target key end

     0   :  { %7 = vsyncpa [#allocation5], 0  ;;  %s969_s0 = inlined_call_operand.hbm [shape: f32[87], index: 0, kind: input, shape index: {}]   ;;  %s970_s1 = inlined_call_operand.hbm [shape: f32[8,8,128], index: 1, kind: input, shape index: {}]   ;;  %s971_s2 = inlined_call_operand.hbm [shape: f32[1,8,128], index: 2, kind: output, shape index: {}]  }
   0x1   :  { %8 = vsyncpa [#allocation3], 0 }
   0x2   :  { %9 = vsyncpa [#allocation4], 0  ;;  %s566_s11 = scalar_lea.hbm %s969_s0, 16 }
   0x3   :  { %p567_p0 = scmp.ne.s32.totalorder %s969_s0, %s566_s11  ;;  %p570_p1 = scmp.lt.u32.totalorder %s566_s11, %s969_s0 }
   0x5   :  { %p572_p2 = pnand %p570_p1, %p567_p0 }
   0x7   :  { %575 = shalt.err (!%p572_p2)
}
   0x8   :  { %s626_s16 = smov [#allocation2]   ;;  %s627_s19 = smov [#allocation6]  }
   0x9   :  { %17 = dma.hbm_to_smem %s969_s0, 16, %s626_s16, [#allocation5]  }
   0xa   :  { %s23_s20 = sshll.u32 %s627_s19, 4  ;;  %s576_s23 = scalar_lea.hbm %s970_s1, 1024  ;;  %s24_s20 = int_to_ptr.vmem [resolvable:$true] %s23_s20 }
   0xb   :  { %p577_p3 = scmp.ne.s32.totalorder %s970_s1, %s576_s23  ;;  %p580_p4 = scmp.lt.u32.totalorder %s576_s23, %s970_s1 }
   0xd   :  { %p582_p5 = pnand %p580_p4, %p577_p3 }
   0xf   :  { %585 = shalt.err (!%p582_p5)
}
  0x10   :  { %s586_s28 = scalar_lea.vmem %s24_s20, 1024  ;;  %p591_p7 = scmp.lt.s32.totalorder %s24_s20, %s24_s20 }
  0x11   :  { %p587_p6 = scmp.ne.s32.totalorder %s24_s20, %s586_s28  ;;  %p592_p8 = scmp.lt.s32.totalorder %s586_s28, %s586_s28 }
  0x13   :  { %p593_p9 = por %p592_p8, %p591_p7 }
  0x15   :  { %p594_p10 = pnand %p593_p9, %p587_p6 }
  0x17   :  { %597 = shalt.err (!%p594_p10)
}
  0x18   :  { %s628_s0 = smov 128   ;;  %s629_s29 = smov 8  }
  0x19   :  { %29 = dma.hbm_to_vmem [thread:$0]  %s970_s1, 1024, %s24_s20, [#allocation3], %s628_s0, %s628_s0, %s629_s29  }
  0x1a   :  { %620 = dma.done.wait [#allocation5], 16  }
  0x1b   :  { %621 = vsyncadd [#allocation5], 4294967280 }
  0x1c   :  { %622 = dma.done.wait [#allocation3], 1024  }
  0x1d   :  { %623 = vsyncadd [#allocation3], 4294966272 }
  0x1e   :  { %36 = sfence }
  0x1f   :  { %s37_s4 = sld [smem:[#allocation2]]  ;;  %s453_s5 = sld [smem:[#allocation2 + $0x1]]  ;;  %v124_v0 = vld [vmem:[#allocation6] sm:$0xff]  ;;  %v686_v3 = vld [vmem:[#allocation6 + $0x8] sm:$0xff]  ;;  %v697_v15 = vld [vmem:[#allocation6 + $0x10] sm:$0xff] }
  0x20   :  { %s454_s6 = sld [smem:[#allocation2 + $0x2]]  ;;  %s455_s7 = sld [smem:[#allocation2 + $0x3]]  ;;  %v718_v28 = vld [vmem:[#allocation6 + $0x18] sm:$0xff]  ;;  %v736_v41 = vld [vmem:[#allocation6 + $0x20] sm:$0xff]  ;;  %v756_v54 = vld [vmem:[#allocation6 + $0x28] sm:$0xff] }
  0x21   :  { %s456_s8 = sld [smem:[#allocation2 + $0x4]]  ;;  %s670_s9 = sld [smem:[#allocation2 + $0x5]] }
  0x22   :  { %s458_s10 = sld [smem:[#allocation2 + $0x6]]  ;;  %s459_s11 = sld [smem:[#allocation2 + $0x7]] }
  0x23   :  { %s672_s12 = sld [smem:[#allocation2 + $0x8]]  ;;  %s674_s13 = sld [smem:[#allocation2 + $0x9]] }
  0x24   :  { %s676_s1 = sld [smem:[#allocation2 + $0xa]]  ;;  %s678_s14 = sld [smem:[#allocation2 + $0xc]] }
  0x25   :  { %s680_s15 = sld [smem:[#allocation2 + $0xd]]  ;;  %v146_v1 = vstv %s37_s4  ;;  %v175_v2 = vstv %s453_s5  ;;  %s682_s16 = sld [smem:[#allocation2 + $0xe]] }
  0x26   :  { %s684_s17 = sld [smem:[#allocation2 + $0xf]]  ;;  %v147_v4 = vmul.f32 %v146_v1, %v124_v0  ;;  %v204_v5 = vstv %s454_s6  ;;  %v233_v6 = vstv %s455_s7  ;;  %v176_v7 = vmul.f32 %v175_v2, %v124_v0  ;;  %s689_s18 = sld [smem:[#allocation2 + $0x12]] }
  0x27   :  { %v205_v8 = vmul.f32 %v204_v5, %v124_v0  ;;  %v262_v9 = vstv %s456_s8  ;;  %v291_v10 = vstv %s670_s9  ;;  %s691_s19 = sld [smem:[#allocation2 + $0x13]]  ;;  %v234_v13 = vmul.f32 %v233_v6, %v124_v0  ;;  %s693_s20 = sld [smem:[#allocation2 + $0x14]] }
  0x28   :  { %v148_v11 = vstv %s458_s10  ;;  %v177_v12 = vstv %s459_s11  ;;  %v263_v14 = vmul.f32 %v262_v9, %v124_v0  ;;  %s695_s21 = sld [smem:[#allocation2 + $0x15]]  ;;  %v706_v23 = vmul.f32 %v291_v10, %v124_v0  ;;  %s708_s22 = sld [smem:[#allocation2 + $0x18]] }
  0x29   :  { %v149_v16 = vmul.f32 %v148_v11, %v686_v3  ;;  %v178_v17 = vmul.f32 %v177_v12, %v686_v3  ;;  %v206_v18 = vstv %s672_s12  ;;  %v235_v19 = vstv %s674_s13  ;;  %s710_s23 = sld [smem:[#allocation2 + $0x19]]  ;;  %s714_s24 = sld [smem:[#allocation2 + $0x1a]] }
  0x2a   :  { %v207_v20 = vmul.f32 %v206_v18, %v686_v3  ;;  %v236_v21 = vmul.f32 %v235_v19, %v686_v3  ;;  %v264_v22 = vstv %s676_s1  ;;  %v151_v25 = vstv %s678_s14  ;;  %s716_s25 = sld [smem:[#allocation2 + $0x1b]]  ;;  %s726_s26 = sld [smem:[#allocation2 + $0x1e]]  ;;  %v796_v18 = vld [vmem:[#allocation6 + $0x38] sm:$0xff] }
  0x2b   :  { %v150_v24 = vadd.f32 %v149_v16, %v147_v4  ;;  %v179_v26 = vadd.f32 %v178_v17, %v176_v7  ;;  %v180_v27 = vstv %s680_s15  ;;  %v152_v29 = vmul.f32 %v151_v25, %v697_v15  ;;  %s728_s27 = sld [smem:[#allocation2 + $0x1f]]  ;;  %s732_s28 = sld [smem:[#allocation2 + $0x20]]  ;;  %v774_v4 = vld [vmem:[#allocation6 + $0x30] sm:$0xff] }
  0x2c   :  { %v181_v30 = vmul.f32 %v180_v27, %v697_v15  ;;  %v208_v31 = vadd.f32 %v207_v20, %v205_v8  ;;  %v209_v32 = vstv %s682_s16  ;;  %v237_v34 = vadd.f32 %v236_v21, %v234_v13  ;;  %s734_s0 = sld [smem:[#allocation2 + $0x21]]  ;;  %s746_s29 = sld [smem:[#allocation2 + $0x24]] }
  0x2d   :  { %v210_v33 = vmul.f32 %v209_v32, %v697_v15  ;;  %v238_v35 = vstv %s684_s17  ;;  %v265_v36 = vmul.f32 %v264_v22, %v686_v3  ;;  %v153_v37 = vadd.f32 %v152_v29, %v150_v24  ;;  %s748_s30 = sld [smem:[#allocation2 + $0x25]]  ;;  %s752_s3 = sld [smem:[#allocation2 + $0x26]] }
  0x2e   :  { %v154_v38 = vstv %s689_s18  ;;  %v182_v39 = vadd.f32 %v181_v30, %v179_v26  ;;  %v183_v40 = vstv %s691_s19  ;;  %v212_v45 = vstv %s693_s20  ;;  %s754_s4 = sld [smem:[#allocation2 + $0x27]]  ;;  %s764_s5 = sld [smem:[#allocation2 + $0x2a]] }
  0x2f   :  { %v155_v42 = vmul.f32 %v154_v38, %v718_v28  ;;  %v184_v43 = vmul.f32 %v183_v40, %v718_v28  ;;  %v211_v44 = vadd.f32 %v210_v33, %v208_v31  ;;  %v213_v46 = vmul.f32 %v212_v45, %v718_v28  ;;  %s766_s6 = sld [smem:[#allocation2 + $0x2b]]  ;;  %s770_s7 = sld [smem:[#allocation2 + $0x2c]] }
  0x30   :  { %v239_v47 = vmul.f32 %v238_v35, %v697_v15  ;;  %v241_v48 = vstv %s695_s21  ;;  %v744_v49 = vadd.f32 %v265_v36, %v263_v14  ;;  %v157_v51 = vstv %s708_s22  ;;  %s772_s8 = sld [smem:[#allocation2 + $0x2d]]  ;;  %s779_s9 = sld [smem:[#allocation2 + $0x10]] }
  0x31   :  { %v156_v50 = vadd.f32 %v155_v42, %v153_v37  ;;  %v185_v52 = vadd.f32 %v184_v43, %v182_v39  ;;  %v186_v53 = vstv %s710_s23  ;;  %v158_v55 = vmul.f32 %v157_v51, %v736_v41  ;;  %s781_s10 = sld [smem:[#allocation2 + $0x16]]  ;;  %s786_s11 = sld [smem:[#allocation2 + $0x30]] }
  0x32   :  { %v187_v56 = vmul.f32 %v186_v53, %v736_v41  ;;  %v214_v57 = vadd.f32 %v213_v46, %v211_v44  ;;  %v215_v58 = vstv %s714_s24  ;;  %v240_v60 = vadd.f32 %v239_v47, %v237_v34  ;;  %s788_s12 = sld [smem:[#allocation2 + $0x31]]  ;;  %s792_s13 = sld [smem:[#allocation2 + $0x32]] }
  0x33   :  { %v216_v59 = vmul.f32 %v215_v58, %v736_v41  ;;  %v242_v61 = vmul.f32 %v241_v48, %v718_v28  ;;  %v244_v62 = vstv %s716_s25  ;;  %v159_v63 = vadd.f32 %v158_v55, %v156_v50  ;;  %s794_s1 = sld [smem:[#allocation2 + $0x33]]  ;;  %s801_s14 = sld [smem:[#allocation2 + $0x1c]] }
  0x34   :  { %v160_v0 = vstv %s726_s26  ;;  %v188_v1 = vadd.f32 %v187_v56, %v185_v52  ;;  %v189_v2 = vstv %s728_s27  ;;  %v218_v8 = vstv %s732_s28  ;;  %s806_s15 = sld [smem:[#allocation2 + $0xb]]  ;;  %s810_s16 = sld [smem:[#allocation2 + $0x22]] }
  0x35   :  { %v161_v5 = vmul.f32 %v160_v0, %v756_v54  ;;  %v190_v6 = vmul.f32 %v189_v2, %v756_v54  ;;  %v217_v7 = vadd.f32 %v216_v59, %v214_v57  ;;  %v219_v9 = vmul.f32 %v218_v8, %v756_v54  ;;  %s812_s17 = sld [smem:[#allocation2 + $0x28]]  ;;  %s820_s18 = sld [smem:[#allocation2 + $0x2e]] }
  0x36   :  { %v243_v10 = vadd.f32 %v242_v61, %v240_v60  ;;  %v245_v11 = vmul.f32 %v244_v62, %v736_v41  ;;  %v247_v12 = vstv %s734_s0  ;;  %v163_v14 = vstv %s746_s29  ;;  %s824_s19 = sld [smem:[#allocation2 + $0x11]]  ;;  %s828_s20 = sld [smem:[#allocation2 + $0x17]] }
  0x37   :  { %v162_v13 = vadd.f32 %v161_v5, %v159_v63  ;;  %v191_v16 = vadd.f32 %v190_v6, %v188_v1  ;;  %v192_v17 = vstv %s748_s30  ;;  %v164_v19 = vmul.f32 %v163_v14, %v774_v4  ;;  %s830_s21 = sld [smem:[#allocation2 + $0x1d]]  ;;  %s836_s22 = sld [smem:[#allocation2 + $0x23]] }
  0x38   :  { %v193_v20 = vmul.f32 %v192_v17, %v774_v4  ;;  %v220_v21 = vadd.f32 %v219_v9, %v217_v7  ;;  %v221_v22 = vstv %s752_s3  ;;  %v246_v25 = vadd.f32 %v245_v11, %v243_v10  ;;  %s842_s23 = sld [smem:[#allocation2 + $0x29]]  ;;  %s844_s24 = sld [smem:[#allocation2 + $0x34]] }
  0x39   :  { %v222_v24 = vmul.f32 %v221_v22, %v774_v4  ;;  %v248_v26 = vmul.f32 %v247_v12, %v756_v54  ;;  %v250_v27 = vstv %s754_s4  ;;  %v165_v29 = vadd.f32 %v164_v19, %v162_v13  ;;  %s850_s25 = sld [smem:[#allocation2 + $0x2f]]  ;;  %s859_s26 = sld [smem:[#allocation2 + $0x35]] }
  0x3a   :  { %v166_v30 = vstv %s764_s5  ;;  %v194_v31 = vadd.f32 %v193_v20, %v191_v16  ;;  %v195_v32 = vstv %s766_s6  ;;  %v224_v36 = vstv %s770_s7  ;;  %s861_s27 = sld [smem:[#allocation2 + $0x36]]  ;;  %s866_s28 = sld [smem:[#allocation2 + $0x37]] }
  0x3b   :  { %v167_v33 = vmul.f32 %v166_v30, %v796_v18  ;;  %v196_v34 = vmul.f32 %v195_v32, %v796_v18  ;;  %v223_v35 = vadd.f32 %v222_v24, %v220_v21  ;;  %v225_v37 = vmul.f32 %v224_v36, %v796_v18  ;;  %s868_s0 = sld [smem:[#allocation2 + $0x3a]]  ;;  %s871_s29 = sld [smem:[#allocation2 + $0x38]] }
  0x3c   :  { %v249_v38 = vadd.f32 %v248_v26, %v246_v25  ;;  %v251_v39 = vmul.f32 %v250_v27, %v774_v4  ;;  %v253_v40 = vstv %s772_s8  ;;  %v169_v43 = vstv %s786_s11  ;;  %s873_s30 = sld [smem:[#allocation2 + $0x3b]]  ;;  %s876_s3 = sld [smem:[#allocation2 + $0x3c]] }
  0x3d   :  { %v168_v42 = vadd.f32 %v167_v33, %v165_v29  ;;  %v197_v44 = vadd.f32 %v196_v34, %v194_v31  ;;  %v198_v45 = vstv %s788_s12  ;;  %v226_v46 = vadd.f32 %v225_v37, %v223_v35  ;;  %s878_s4 = sld [smem:[#allocation2 + $0x3e]]  ;;  %s882_s5 = sld [smem:[#allocation2 + $0x3f]] }
  0x3e   :  { %v227_v47 = vstv %s792_s13  ;;  %v252_v48 = vadd.f32 %v251_v39, %v249_v38  ;;  %v254_v50 = vmul.f32 %v253_v40, %v796_v18  ;;  %v256_v53 = vstv %s794_s1  ;;  %s886_s6 = sld [smem:[#allocation2 + $0x40]]  ;;  %s889_s7 = sld [smem:[#allocation2 + $0x42]] }
  0x3f   :  { %v170_v51 = vadd.f32 %v169_v43, %v168_v42  ;;  %v199_v52 = vadd.f32 %v198_v45, %v197_v44  ;;  %v267_v55 = vstv %s779_s9  ;;  %v228_v56 = vadd.f32 %v227_v47, %v226_v46  ;;  %s891_s8 = sld [smem:[#allocation2 + $0x43]]  ;;  %s894_s9 = sld [smem:[#allocation2 + $0x39]] }
  0x40   :  { %v255_v57 = vadd.f32 %v254_v50, %v252_v48  ;;  %v268_v58 = vmul.f32 %v267_v55, %v697_v15  ;;  %v270_v59 = vstv %s781_s10  ;;  %v273_v63 = vstv %s801_s14  ;;  %s898_s10 = sld [smem:[#allocation2 + $0x3d]]  ;;  %s902_s11 = sld [smem:[#allocation2 + $0x41]] }
  0x41   :  { %v171_v60 = vmul.f32 0.5, %v170_v51  ;;  %v200_v61 = vmul.f32 0.5, %v199_v52  ;;  %v271_v62 = vmul.f32 %v270_v59, %v718_v28  ;;  %v229_v0 = vmul.f32 0.5, %v228_v56  ;;  %s904_s12 = sld [smem:[#allocation2 + $0x44]]  ;;  %s910_s13 = sld [smem:[#allocation2 + $0x45]] }
  0x42   :  { %v257_v1 = vadd.f32 %v256_v53, %v255_v57  ;;  %v269_v2 = vadd.f32 %v268_v58, %v744_v49  ;;  %v274_v5 = vmul.f32 %v273_v63, %v736_v41  ;;  %v276_v6 = vstv %s810_s16  ;;  %s914_s1 = sld [smem:[#allocation2 + $0x46]]  ;;  %s916_s14 = sld [smem:[#allocation2 + $0x47]] }
  0x43   :  { %544 = vtanh.f32 %v171_v60  ;;  %v279_v7 = vstv %s812_s17  ;;  %v293_v8 = vstv %s806_s15  ;;  %v277_v11 = vmul.f32 %v276_v6, %v756_v54  ;;  %s920_s15 = sld [smem:[#allocation2 + $0x48]]  ;;  %s922_s16 = sld [smem:[#allocation2 + $0x49]] }
  0x44   :  { %546 = vtanh.f32 %v200_v61  ;;  %v258_v9 = vmul.f32 0.5, %v257_v1  ;;  %v272_v10 = vadd.f32 %v271_v62, %v269_v2  ;;  %v282_v49 = vstv %s820_s18  ;;  %s929_s17 = sld [smem:[#allocation2 + $0x4a]]  ;;  %s931_s18 = sld [smem:[#allocation2 + $0x4b]] }
  0x45   :  { %548 = vtanh.f32 %v229_v0  ;;  %v280_v13 = vmul.f32 %v279_v7, %v774_v4  ;;  %v294_v14 = vmul.f32 %v293_v8, %v686_v3  ;;  %v296_v16 = vstv %s824_s19  ;;  %s933_s19 = sld [smem:[#allocation2 + $0x4c]] }
  0x46   :  { %v275_v12 = vadd.f32 %v274_v5, %v272_v10  ;;  %550 = vtanh.f32 %v258_v9  ;;  %v297_v17 = vmul.f32 %v296_v16, %v697_v15  ;;  %v299_v19 = vstv %s828_s20  ;;  %s935_s20 = sld [smem:[#allocation2 + $0x4d]] }
  0x47   :  { %v302_v20 = vstv %s830_s21  ;;  %v283_v22 = vmul.f32 %v282_v49, %v796_v18  ;;  %v295_v24 = vadd.f32 %v294_v14, %v706_v23  ;;  %v300_v25 = vmul.f32 %v299_v19, %v718_v28  ;;  %s941_s21 = sld [smem:[#allocation2 + $0x4e]] }
  0x48   :  { %v278_v21 = vadd.f32 %v277_v11, %v275_v12  ;;  %v305_v3 = vstv %s836_s22  ;;  %v303_v27 = vmul.f32 %v302_v20, %v736_v41  ;;  %v285_v23 = vstv %s844_s24  ;;  %s943_s22 = sld [smem:[#allocation2 + $0x4f]]  ;;  %s947_s24 = sld [smem:[#allocation2 + $0x51]] }
  0x49   :  { %v298_v26 = vadd.f32 %v297_v17, %v295_v24  ;;  %v308_v28 = vstv %s842_s23  ;;  %v306_v31 = vmul.f32 %v305_v3, %v756_v54  ;;  %v311_v33 = vstv %s850_s25  ;;  %s945_s23 = sld [smem:[#allocation2 + $0x50]]  ;;  %s534_s25 = sld [smem:[#allocation2 + $0x52]] }
  0x4a   :  { %v281_v15 = vadd.f32 %v280_v13, %v278_v21  ;;  %v309_v37 = vmul.f32 %v308_v28, %v774_v4  ;;  %v312_v43 = vmul.f32 %v311_v33, %v796_v18  ;;  %v320_v46 = vstv %s861_s27  ;;  %s536_s27 = sld [smem:[#allocation2 + $0x54]] }
  0x4b   :  { %v301_v30 = vadd.f32 %v300_v25, %v298_v26  ;;  %v322_v47 = vstv %s868_s0  ;;  %v343_v50 = vstv %s866_s28  ;;  %v345_v51 = vstv %s873_s30  ;;  %s537_s28 = sld [smem:[#allocation2 + $0x55]]  ;;  %s538_s0 = sld [smem:[#allocation2 + $0x56]] }
  0x4c   :  { %v284_v29 = vadd.f32 %v283_v22, %v281_v15  ;;  %v314_v18 = vstv %s859_s26  ;;  %v325_v52 = vstv %s878_s4  ;;  %v366_v53 = vstv %s871_s29  ;;  %s535_s26 = sld [smem:[#allocation2 + $0x53]]  ;;  %s630_s29 = smov [#allocation7]  }
  0x4d   :  { %v545_v32 = vpop.eup %544  ;;  %v304_v36 = vadd.f32 %v303_v27, %v301_v30  ;;  %v368_v55 = vstv %s876_s3  ;;  %v348_v59 = vstv %s882_s5  ;;  %v371_v5 = vstv %s886_s6  ;;  %s436_s30 = sshll.u32 %s630_s29, 4  ;;  %s437_s30 = int_to_ptr.vmem [resolvable:$true] %s436_s30 }
  0x4e   :  { %v547_v34 = vpop.eup %546  ;;  %v173_v35 = vmul.f32 0.5, %v545_v32  ;;  %v286_v41 = vadd.f32 %v285_v23, %v284_v29  ;;  %v328_v6 = vstv %s889_s7  ;;  %v351_v7 = vstv %s891_s8  ;;  %s598_s3 = scalar_lea.vmem %s437_s30, 128  ;;  %p603_p12 = scmp.lt.s32.totalorder %s437_s30, %s437_s30 }
  0x4f   :  { %v549_v38 = vpop.eup %548  ;;  %v202_v54 = vmul.f32 0.5, %v547_v34  ;;  %v307_v42 = vadd.f32 %v306_v31, %v304_v36  ;;  %v389_v14 = vstv %s894_s9  ;;  %v391_v19 = vstv %s898_s10  ;;  %p599_p11 = scmp.ne.s32.totalorder %s437_s30, %s598_s3  ;;  %p604_p13 = scmp.lt.s32.totalorder %s598_s3, %s598_s3 }
  0x50   :  { %v231_v39 = vmul.f32 0.5, %v549_v38  ;;  %v287_v40 = vmul.f32 0.5, %v286_v41  ;;  %v551_v44 = vpop.eup %550  ;;  %v174_v4 = vadd.f32 0.5, %v173_v35  ;;  %v374_v20 = vstv %s904_s12 }
  0x51   :  { %v203_v45 = vadd.f32 0.5, %v202_v54  ;;  %v310_v48 = vadd.f32 %v309_v37, %v307_v42  ;;  %v260_v57 = vmul.f32 0.5, %v551_v44  ;;  %v394_v22 = vstv %s902_s11  ;;  %p605_p0 = por %p604_p13, %p603_p12 }
  0x52   :  { %552 = vtanh.f32 %v287_v40  ;;  %v232_v56 = vadd.f32 0.5, %v231_v39  ;;  %v321_v60 = vmul.f32 %v320_v46, %v174_v4  ;;  %v344_v62 = vmul.f32 %v343_v50, %v174_v4 }
  0x53   :  { %v313_v58 = vadd.f32 %v312_v43, %v310_v48  ;;  %v323_v61 = vmul.f32 %v322_v47, %v203_v45  ;;  %v346_v63 = vmul.f32 %v345_v51, %v203_v45  ;;  %v367_v1 = vmul.f32 %v366_v53, %v174_v4  ;;  %p606_p1 = pnand %p605_p0, %p599_p11 }
  0x54   :  { %v369_v2 = vmul.f32 %v368_v55, %v203_v45  ;;  %v261_v8 = vadd.f32 0.5, %v260_v57  ;;  %v326_v10 = vmul.f32 %v325_v52, %v232_v56  ;;  %v349_v11 = vmul.f32 %v348_v59, %v232_v56 }
  0x55   :  { %v315_v0 = vadd.f32 %v314_v18, %v313_v58  ;;  %v324_v49 = vadd.f32 %v323_v61, %v321_v60  ;;  %v347_v12 = vadd.f32 %v346_v63, %v344_v62  ;;  %v372_v13 = vmul.f32 %v371_v5, %v232_v56 }
  0x56   :  { %v370_v16 = vadd.f32 %v369_v2, %v367_v1  ;;  %v390_v17 = vmul.f32 %v389_v14, %v174_v4  ;;  %v392_v21 = vmul.f32 %v391_v19, %v203_v45  ;;  %v395_v25 = vmul.f32 %v394_v22, %v232_v56 }
  0x57   :  { %v316_v9 = vmul.f32 0.5, %v315_v0  ;;  %v397_v3 = vstv %s910_s13  ;;  %v329_v26 = vmul.f32 %v328_v6, %v261_v8  ;;  %v352_v27 = vmul.f32 %v351_v7, %v261_v8 }
  0x58   :  { %v393_v23 = vadd.f32 %v392_v21, %v390_v17  ;;  %v327_v28 = vadd.f32 %v326_v10, %v324_v49  ;;  %v350_v29 = vadd.f32 %v349_v11, %v347_v12  ;;  %v373_v30 = vadd.f32 %v372_v13, %v370_v16 }
  0x59   :  { %554 = vtanh.f32 %v316_v9  ;;  %v375_v31 = vmul.f32 %v374_v20, %v261_v8  ;;  %v331_v33 = vstv %s914_s1  ;;  %v398_v35 = vmul.f32 %v397_v3, %v261_v8 }
  0x5a   :  { %v396_v34 = vadd.f32 %v395_v25, %v393_v23  ;;  %v354_v41 = vstv %s916_s14  ;;  %v377_v36 = vstv %s920_s15  ;;  %v400_v37 = vstv %s922_s16 }
  0x5b   :  { %v330_v38 = vadd.f32 %v329_v26, %v327_v28  ;;  %v353_v39 = vadd.f32 %v352_v27, %v350_v29  ;;  %v376_v40 = vadd.f32 %v375_v31, %v373_v30  ;;  %v334_v47 = vstv %s929_s17 }
  0x5c   :  { %v553_v24 = vpop.eup %552  ;;  %v399_v44 = vadd.f32 %v398_v35, %v396_v34  ;;  %v357_v50 = vstv %s931_s18  ;;  %v380_v51 = vstv %s933_s19  ;;  %v403_v18 = vstv %s935_s20 }
  0x5d   :  { %v289_v15 = vmul.f32 0.5, %v553_v24  ;;  %v337_v61 = vstv %s941_s21  ;;  %v360_v62 = vstv %s943_s22  ;;  %v383_v63 = vstv %s945_s23 }
  0x5e   :  { %v406_v0 = vstv %s947_s24  ;;  %v412_v21 = vstv %s534_s25  ;;  %v414_v3 = vstv %s535_s26  ;;  %v417_v27 = vstv %s536_s27 }
  0x5f   :  { %v290_v32 = vadd.f32 0.5, %v289_v15  ;;  %v420_v29 = vstv %s537_s28 }
  0x61   :  { %v332_v54 = vmul.f32 %v331_v33, %v290_v32  ;;  %v355_v42 = vmul.f32 %v354_v41, %v290_v32  ;;  %v378_v43 = vmul.f32 %v377_v36, %v290_v32  ;;  %v401_v4 = vmul.f32 %v400_v37, %v290_v32 }
  0x62   :  { %v423_v41 = vstv %s538_s0 }
  0x63   :  { %v555_v45 = vpop.eup %554  ;;  %v333_v48 = vadd.f32 %v332_v54, %v330_v38  ;;  %v356_v53 = vadd.f32 %v355_v42, %v353_v39  ;;  %v379_v55 = vadd.f32 %v378_v43, %v376_v40  ;;  %v402_v56 = vadd.f32 %v401_v4, %v399_v44 }
  0x64   :  { %v318_v46 = vmul.f32 0.5, %v555_v45 }
  0x66   :  { %v319_v52 = vadd.f32 0.5, %v318_v46 }
  0x68   :  { %v335_v57 = vmul.f32 %v334_v47, %v319_v52  ;;  %v358_v58 = vmul.f32 %v357_v50, %v319_v52  ;;  %v381_v59 = vmul.f32 %v380_v51, %v319_v52  ;;  %v404_v60 = vmul.f32 %v403_v18, %v319_v52 }
  0x6a   :  { %v336_v1 = vadd.f32 %v335_v57, %v333_v48  ;;  %v359_v2 = vadd.f32 %v358_v58, %v356_v53  ;;  %v382_v5 = vadd.f32 %v381_v59, %v379_v55  ;;  %v405_v6 = vadd.f32 %v404_v60, %v402_v56 }
  0x6c   :  { %v338_v7 = vadd.f32 %v337_v61, %v336_v1  ;;  %v361_v8 = vadd.f32 %v360_v62, %v359_v2  ;;  %v384_v9 = vadd.f32 %v383_v63, %v382_v5  ;;  %v407_v10 = vadd.f32 %v406_v0, %v405_v6 }
  0x6e   :  { %v339_v11 = vmul.f32 0.5, %v338_v7  ;;  %v362_v49 = vmul.f32 0.5, %v361_v8  ;;  %v385_v12 = vmul.f32 0.5, %v384_v9  ;;  %v408_v13 = vmul.f32 0.5, %v407_v10 }
  0x70   :  { %556 = vtanh.f32 %v339_v11 }
  0x71   :  { %558 = vtanh.f32 %v362_v49 }
  0x72   :  { %560 = vtanh.f32 %v385_v12 }
  0x73   :  { %562 = vtanh.f32 %v408_v13 }
  0x7a   :  { %v557_v14 = vpop.eup %556 }
  0x7b   :  { %v559_v16 = vpop.eup %558  ;;  %v341_v17 = vmul.f32 0.5, %v557_v14 }
  0x7c   :  { %v561_v19 = vpop.eup %560  ;;  %v364_v20 = vmul.f32 0.5, %v559_v16 }
  0x7d   :  { %v563_v22 = vpop.eup %562  ;;  %v342_v24 = vadd.f32 0.5, %v341_v17  ;;  %v387_v25 = vmul.f32 0.5, %v561_v19 }
  0x7e   :  { %v365_v15 = vadd.f32 0.5, %v364_v20  ;;  %v410_v26 = vmul.f32 0.5, %v563_v22 }
  0x7f   :  { %v388_v23 = vadd.f32 0.5, %v387_v25  ;;  %v413_v28 = vmul.f32 %v412_v21, %v342_v24 }
  0x80   :  { %v411_v30 = vadd.f32 0.5, %v410_v26  ;;  %v415_v31 = vmul.f32 %v414_v3, %v365_v15 }
  0x81   :  { %v418_v32 = vmul.f32 %v417_v27, %v388_v23 }
  0x82   :  { %v416_v33 = vadd.f32 %v415_v31, %v413_v28  ;;  %v421_v34 = vmul.f32 %v420_v29, %v411_v30 }
  0x84   :  { %v419_v35 = vadd.f32 %v418_v32, %v416_v33 }
  0x86   :  { %v422_v36 = vadd.f32 %v421_v34, %v419_v35 }
  0x88   :  { %v424_v37 = vadd.f32 %v423_v41, %v422_v36 }
  0x8a   :  { %v425_v38 = vmul.f32 0.5, %v424_v37 }
  0x8c   :  { %564 = vtanh.f32 %v425_v38 }
  0x96   :  { %v565_v54 = vpop.eup %564 }
  0x97   :  { %v427_v39 = vmul.f32 0.5, %v565_v54 }
  0x99   :  { %v428_v40 = vadd.f32 0.5, %v427_v39 }
  0x9b   :  { %429 = vst [vmem:[#allocation7] sm:$0xff] %v428_v40 }
  0x9c   :  { %609 = shalt.err (!%p606_p1)
}
  0x9d   :  { %s610_s6 = scalar_lea.hbm %s971_s2, 128 }
  0x9e   :  { %p611_p2 = scmp.ne.s32.totalorder %s971_s2, %s610_s6  ;;  %p614_p3 = scmp.lt.u32.totalorder %s610_s6, %s971_s2 }
  0xa0   :  { %p616_p4 = pnand %p614_p3, %p611_p2 }
  0xa2   :  { %619 = shalt.err (!%p616_p4)
}
  0xa3   :  { %439 = dma.vmem_to_hbm [thread:$0]  %s437_s30, 128, %s971_s2, [#allocation4]  }
  0xa4   :  { %624 = dma.done.wait [#allocation4], 128  }
  0xa5   :  { %625 = vsyncadd [#allocation4], 4294967168 }
  0xa6   :  { %443 = vsyncpa [#allocation3], 1 }
  0xa7   :  { %444 = vsyncpa [#allocation4], 1 }
  0xa8   :  { %445 = vsyncpa [#allocation5], 1 }

</bundles_post_ra>
